<compile_context>
chip_gen: v7x
topology: tpu7x:2x2x1
jax: 0.10.0
libtpu: 0.0.40
codegen_flags: <defaults>
</compile_context>

<pallas_src>
import numpy as np
import jax
import jax.numpy as jnp
from jax.experimental import pallas as pl
from jax.experimental.pallas import tpu as pltpu

LANE = 128  # TPU lane width: hidden dim and output last dim are padded to this.


# ----------------------------------------------------------------------------
# Pallas kernel: both ClusterNet MLPs (eval=0, target=1) in one body.
# ----------------------------------------------------------------------------
def _cluster_qnet_kernel(se_ref, xc_ref, w1s_ref, w1c_ref, b1_ref, w2_ref,
                         b2_ref, q_ref):
    se = se_ref[...]                      # [1, S]   shared state embedding
    xc = xc_ref[...]                      # [N, C]   per-cluster states
    n = xc.shape[0]
    for net in range(2):                  # static unroll: 0 = eval, 1 = target
        # state half of fc1 (shared across all clusters) + b1, once per net
        row = jnp.dot(se, w1s_ref[net],
                      preferred_element_type=jnp.float32) + b1_ref[net]   # [1, Hp]
        # cluster half of fc1
        h = jnp.dot(xc, w1c_ref[net],
                    preferred_element_type=jnp.float32) + row             # [N, Hp]
        h = jnp.maximum(h, 0.0)
        # output layer: VPU multiply + lane reduce (no 1-column MXU matmul)
        q = jnp.sum(h * w2_ref[net], axis=-1, keepdims=True) + b2_ref[net]  # [N, 1]
        # lane-dense store: broadcast across 128 lanes; wrapper reads lane 0
        q_ref[net] = jnp.broadcast_to(q, (n, LANE)).astype(q_ref.dtype)


@jax.jit
def cluster_qnet_apply_both(state_emb_row, cluster_states, packed):
    """One launch -> q values of both nets. Returns [2, N] (eval row 0, target row 1)."""
    n = cluster_states.shape[0]
    vmem = pl.BlockSpec(memory_space=pltpu.MemorySpace.VMEM)
    smem = pl.BlockSpec(memory_space=pltpu.MemorySpace.SMEM)
    out = pl.pallas_call(
        _cluster_qnet_kernel,
        out_shape=jax.ShapeDtypeStruct((2, n, LANE), jnp.float32),
        in_specs=[vmem, vmem, vmem, vmem, vmem, vmem, smem],
        out_specs=vmem,
    )(state_emb_row, cluster_states, packed["w1s"], packed["w1c"],
      packed["b1"], packed["w2"], packed["b2"])
    # TODO(synk): if num_clusters grows into the thousands, tile the cluster
    # axis with a grid + BlockSpec((TILE_N, C), ...) and dimension_semantics=
    # ("parallel",) (and bf16 MXU inputs); at N~8 a single block is optimal.
    return out[:, :, 0]                   # [2, N]


# ----------------------------------------------------------------------------
# Parameter construction (deterministic; mirrors ClusterNet.__init__)
# ----------------------------------------------------------------------------
def init_cluster_net_params(key, state_dim, cluster_state_dim, hidden_dim,
                            init_w=1e-6):
    in_dim = state_dim + cluster_state_dim
    k1, k2, k3, k4 = jax.random.split(key, 4)
    # fc1.weight = fanin_init((hidden, in_dim)); fanin = size[0] = hidden_dim
    v = 1.0 / np.sqrt(hidden_dim)
    w1 = jax.random.uniform(k1, (hidden_dim, in_dim), jnp.float32, -v, v)
    # fc1.bias: PyTorch default uniform(-1/sqrt(in_features), +...)
    bnd = 1.0 / np.sqrt(in_dim)
    b1 = jax.random.uniform(k2, (hidden_dim,), jnp.float32, -bnd, bnd)
    # out.weight ~ Normal(mean=-init_w, std=init_w)
    w2 = -init_w + init_w * jax.random.normal(k3, (1, hidden_dim), jnp.float32)
    # out.bias: PyTorch default uniform(-1/sqrt(hidden), +...)
    bnd2 = 1.0 / np.sqrt(hidden_dim)
    b2 = jax.random.uniform(k4, (1,), jnp.float32, -bnd2, bnd2)
    return dict(w1=w1, b1=b1, w2=w2, b2=b2)


def pack_cluster_dqn_params(eval_params, target_params, state_dim,
                            hidden_pad=LANE):
    """One-time packing (outside the hot path): transpose, split fc1, pad
    hidden dim to `hidden_pad` lanes, stack eval/target along a net axis."""
    def pack_one(p):
        w1_t = p["w1"].T                                    # [S+C, H]
        h = w1_t.shape[1]
        assert h <= hidden_pad
        pad = hidden_pad - h
        w1s = jnp.pad(w1_t[:state_dim], ((0, 0), (0, pad)))  # [S, Hp]
        w1c = jnp.pad(w1_t[state_dim:], ((0, 0), (0, pad)))  # [C, Hp]
        b1 = jnp.pad(p["b1"], (0, pad))[None, :]             # [1, Hp]
        w2 = jnp.pad(p["w2"][0], (0, pad))[None, :]          # [1, Hp]
        return w1s, w1c, b1, w2, p["b2"][0]

    e, t = pack_one(eval_params), pack_one(target_params)
    return dict(
        w1s=jnp.stack([e[0], t[0]]),      # [2, S, Hp]
        w1c=jnp.stack([e[1], t[1]]),      # [2, C, Hp]
        b1=jnp.stack([e[2], t[2]]),       # [2, 1, Hp]
        w2=jnp.stack([e[3], t[3]]),       # [2, 1, Hp]
        b2=jnp.stack([e[4], t[4]]),       # [2]  (SMEM scalars)
    )


# ----------------------------------------------------------------------------
# ClusterDQNNetwork.forward equivalent (cached_state_emb / cached_cluster_state path)
# ----------------------------------------------------------------------------
def cluster_dqn_forward_both(state_emb, cluster_states, packed_params):
    """One kernel launch -> (q_eval [N,1], q_target [N,1], cluster_states, state_emb)."""
    q_both = cluster_qnet_apply_both(
        state_emb.reshape(1, -1).astype(jnp.float32),
        cluster_states.astype(jnp.float32), packed_params)
    return q_both[0][:, None], q_both[1][:, None], cluster_states, state_emb


def cluster_dqn_forward(state_emb, cluster_states, packed_params, for_next=False):
    """Matches forward(): for_next=False -> eval_net, True -> target_net.
    Both nets are computed in one launch (the extra ~8 KFLOP is free next to
    dispatch cost); the requested one is returned."""
    q_eval, q_target, sel, s_emb = cluster_dqn_forward_both(
        state_emb, cluster_states, packed_params)
    q_vals = q_target if for_next else q_eval
    return q_vals, sel, s_emb


# pure-JAX reference (per-cluster loop batched) for correctness check
def _reference_forward(state_emb, cluster_states, params):
    n = cluster_states.shape[0]
    x = jnp.concatenate(
        [jnp.broadcast_to(state_emb[None, :], (n, state_emb.shape[0])),
         cluster_states], axis=1)
    h = jnp.maximum(x @ params["w1"].T + params["b1"], 0.0)
    return h @ params["w2"].T + params["b2"]


if __name__ == "__main__":
    STATE_DIM = 32
    CLUSTER_STATE_DIM = 32
    HIDDEN_DIM = 32
    NUM_CLUSTERS = 8

    key = jax.random.PRNGKey(0)
    k_eval, k_tgt, k_state, k_clusters = jax.random.split(key, 4)

    eval_params = init_cluster_net_params(k_eval, STATE_DIM, CLUSTER_STATE_DIM,
                                          HIDDEN_DIM, init_w=1e-6)
    target_params = init_cluster_net_params(k_tgt, STATE_DIM, CLUSTER_STATE_DIM,
                                            HIDDEN_DIM, init_w=1e-6)
    # one-time packing: pre-transposed / split / padded / stacked weights
    packed = pack_cluster_dqn_params(eval_params, target_params, STATE_DIM)

    state_emb = jax.random.normal(k_state, (STATE_DIM,), jnp.float32)
    cluster_states = jax.random.normal(
        k_clusters, (NUM_CLUSTERS, CLUSTER_STATE_DIM), jnp.float32)

    # eval_net path (get_q_value) and target_net path (get_q_value_next),
    # both produced by a single fused pallas_call.
    q_eval, q_next, sel_states, s_emb = cluster_dqn_forward_both(
        state_emb, cluster_states, packed)
    q_eval = jax.block_until_ready(q_eval)
    q_next = jax.block_until_ready(q_next)

    q_eval_ref = _reference_forward(state_emb, cluster_states, eval_params)
    q_next_ref = _reference_forward(state_emb, cluster_states, target_params)
    assert q_eval.shape == (NUM_CLUSTERS, 1) and q_next.shape == (NUM_CLUSTERS, 1)
    np.testing.assert_allclose(np.asarray(q_eval), np.asarray(q_eval_ref),
                               rtol=1e-5, atol=1e-5)
    np.testing.assert_allclose(np.asarray(q_next), np.asarray(q_next_ref),
                               rtol=1e-5, atol=1e-5)

    # also exercise the forward(for_next=...) selection API
    q_sel, _, _ = cluster_dqn_forward(state_emb, cluster_states, packed,
                                      for_next=True)
    jax.block_until_ready(q_sel)
    np.testing.assert_allclose(np.asarray(q_sel), np.asarray(q_next_ref),
                               rtol=1e-5, atol=1e-5)

    # TODO(synk): feature_state_generation / pandas cluster-indexing and the
    # epsilon-greedy select_action logic are host-side data wrangling with no
    # Pallas equivalent; state_emb and cluster_states are precomputed inputs.
    print("KERNEL_OK")
</pallas_src>

<mosaic_0001>
module attributes {stable_mosaic.version = 11 : i64} {
  func.func @_cluster_qnet_kernel(%arg0: memref<1x32xf32, #tpu.memory_space<vmem>>, %arg1: memref<8x32xf32, #tpu.memory_space<vmem>>, %arg2: memref<2x32x128xf32, #tpu.memory_space<vmem>>, %arg3: memref<2x32x128xf32, #tpu.memory_space<vmem>>, %arg4: memref<2x1x128xf32, #tpu.memory_space<vmem>>, %arg5: memref<2x1x128xf32, #tpu.memory_space<vmem>>, %arg6: memref<2xf32, #tpu.memory_space<smem>>, %arg7: memref<2x8x128xf32, #tpu.memory_space<vmem>>) attributes {dimension_semantics = [], scalar_prefetch = 0 : i64, scratch_operands = 0 : i64, tpu.core_type = #tpu.core_type<tc>} {
    %c0 = arith.constant 0 : index
    %c0_0 = arith.constant 0 : index
    %0 = vector.load %arg0[%c0, %c0_0] : memref<1x32xf32, #tpu.memory_space<vmem>>, vector<1x32xf32>
    %c0_1 = arith.constant 0 : index
    %c0_2 = arith.constant 0 : index
    %1 = vector.load %arg1[%c0_1, %c0_2] : memref<8x32xf32, #tpu.memory_space<vmem>>, vector<8x32xf32>
    %c0_3 = arith.constant 0 : index
    %c0_4 = arith.constant 0 : index
    %c0_5 = arith.constant 0 : index
    %2 = vector.load %arg2[%c0_3, %c0_4, %c0_5] : memref<2x32x128xf32, #tpu.memory_space<vmem>>, vector<1x32x128xf32>
    %3 = vector.shape_cast %2 : vector<1x32x128xf32> to vector<32x128xf32>
    %cst = arith.constant dense<0.000000e+00> : vector<1x128xf32>
    %4 = tpu.matmul %0, %3, %cst {dimension_numbers = #tpu.dot_dimension_numbers<[1], [0], [0], [1], [0, 0, 1, 1], [], []>} : vector<1x32xf32>, vector<32x128xf32>, vector<1x128xf32> -> vector<1x128xf32>
    %c0_6 = arith.constant 0 : index
    %c0_7 = arith.constant 0 : index
    %c0_8 = arith.constant 0 : index
    %5 = vector.load %arg4[%c0_6, %c0_7, %c0_8] : memref<2x1x128xf32, #tpu.memory_space<vmem>>, vector<1x1x128xf32>
    %6 = vector.shape_cast %5 : vector<1x1x128xf32> to vector<1x128xf32>
    %7 = arith.addf %4, %6 : vector<1x128xf32>
    %c0_9 = arith.constant 0 : index
    %c0_10 = arith.constant 0 : index
    %c0_11 = arith.constant 0 : index
    %8 = vector.load %arg3[%c0_9, %c0_10, %c0_11] : memref<2x32x128xf32, #tpu.memory_space<vmem>>, vector<1x32x128xf32>
    %9 = vector.shape_cast %8 : vector<1x32x128xf32> to vector<32x128xf32>
    %cst_12 = arith.constant dense<0.000000e+00> : vector<8x128xf32>
    %10 = tpu.matmul %1, %9, %cst_12 {dimension_numbers = #tpu.dot_dimension_numbers<[1], [0], [0], [1], [0, 0, 1, 1], [], []>} : vector<8x32xf32>, vector<32x128xf32>, vector<8x128xf32> -> vector<8x128xf32>
    %11 = vector.broadcast %7 : vector<1x128xf32> to vector<8x128xf32>
    %12 = arith.addf %10, %11 : vector<8x128xf32>
    %cst_13 = arith.constant 0.000000e+00 : f32
    %13 = vector.broadcast %cst_13 : f32 to vector<8x128xf32>
    %14 = arith.maximumf %12, %13 : vector<8x128xf32>
    %c0_14 = arith.constant 0 : index
    %c0_15 = arith.constant 0 : index
    %c0_16 = arith.constant 0 : index
    %15 = vector.load %arg5[%c0_14, %c0_15, %c0_16] : memref<2x1x128xf32, #tpu.memory_space<vmem>>, vector<1x1x128xf32>
    %16 = vector.shape_cast %15 : vector<1x1x128xf32> to vector<1x128xf32>
    %17 = vector.broadcast %16 : vector<1x128xf32> to vector<8x128xf32>
    %18 = arith.mulf %14, %17 : vector<8x128xf32>
    %cst_17 = arith.constant dense<0.000000e+00> : vector<8xf32>
    %19 = vector.multi_reduction <add>, %18, %cst_17 [1] : vector<8x128xf32> to vector<8xf32>
    %20 = vector.shape_cast %19 : vector<8xf32> to vector<8x1xf32>
    %c0_18 = arith.constant 0 : index
    %21 = memref.load %arg6[%c0_18] : memref<2xf32, #tpu.memory_space<smem>>
    %22 = vector.broadcast %21 : f32 to vector<8x1xf32>
    %23 = arith.addf %20, %22 : vector<8x1xf32>
    %24 = vector.shape_cast %23 : vector<8x1xf32> to vector<8x1xf32>
    %25 = vector.broadcast %24 : vector<8x1xf32> to vector<8x128xf32>
    %c0_19 = arith.constant 0 : index
    %c0_20 = arith.constant 0 : index
    %c0_21 = arith.constant 0 : index
    %26 = vector.load %arg7[%c0_19, %c0_20, %c0_21] : memref<2x8x128xf32, #tpu.memory_space<vmem>>, vector<1x8x128xf32>
    %27 = vector.shape_cast %26 : vector<1x8x128xf32> to vector<8x128xf32>
    %28 = vector.shape_cast %25 : vector<8x128xf32> to vector<1x8x128xf32>
    tpu.vector_store %arg7[%c0_19, %c0_20, %c0_21], %28 {strides = array<i32>} : memref<2x8x128xf32, #tpu.memory_space<vmem>>, vector<1x8x128xf32>,
    %c1 = arith.constant 1 : index
    %c0_22 = arith.constant 0 : index
    %c0_23 = arith.constant 0 : index
    %29 = vector.load %arg2[%c1, %c0_22, %c0_23] : memref<2x32x128xf32, #tpu.memory_space<vmem>>, vector<1x32x128xf32>
    %30 = vector.shape_cast %29 : vector<1x32x128xf32> to vector<32x128xf32>
    %cst_24 = arith.constant dense<0.000000e+00> : vector<1x128xf32>
    %31 = tpu.matmul %0, %30, %cst_24 {dimension_numbers = #tpu.dot_dimension_numbers<[1], [0], [0], [1], [0, 0, 1, 1], [], []>} : vector<1x32xf32>, vector<32x128xf32>, vector<1x128xf32> -> vector<1x128xf32>
    %c1_25 = arith.constant 1 : index
    %c0_26 = arith.constant 0 : index
    %c0_27 = arith.constant 0 : index
    %32 = vector.load %arg4[%c1_25, %c0_26, %c0_27] : memref<2x1x128xf32, #tpu.memory_space<vmem>>, vector<1x1x128xf32>
    %33 = vector.shape_cast %32 : vector<1x1x128xf32> to vector<1x128xf32>
    %34 = arith.addf %31, %33 : vector<1x128xf32>
    %c1_28 = arith.constant 1 : index
    %c0_29 = arith.constant 0 : index
    %c0_30 = arith.constant 0 : index
    %35 = vector.load %arg3[%c1_28, %c0_29, %c0_30] : memref<2x32x128xf32, #tpu.memory_space<vmem>>, vector<1x32x128xf32>
    %36 = vector.shape_cast %35 : vector<1x32x128xf32> to vector<32x128xf32>
    %cst_31 = arith.constant dense<0.000000e+00> : vector<8x128xf32>
    %37 = tpu.matmul %1, %36, %cst_31 {dimension_numbers = #tpu.dot_dimension_numbers<[1], [0], [0], [1], [0, 0, 1, 1], [], []>} : vector<8x32xf32>, vector<32x128xf32>, vector<8x128xf32> -> vector<8x128xf32>
    %38 = vector.broadcast %34 : vector<1x128xf32> to vector<8x128xf32>
    %39 = arith.addf %37, %38 : vector<8x128xf32>
    %cst_32 = arith.constant 0.000000e+00 : f32
    %40 = vector.broadcast %cst_32 : f32 to vector<8x128xf32>
    %41 = arith.maximumf %39, %40 : vector<8x128xf32>
    %c1_33 = arith.constant 1 : index
    %c0_34 = arith.constant 0 : index
    %c0_35 = arith.constant 0 : index
    %42 = vector.load %arg5[%c1_33, %c0_34, %c0_35] : memref<2x1x128xf32, #tpu.memory_space<vmem>>, vector<1x1x128xf32>
    %43 = vector.shape_cast %42 : vector<1x1x128xf32> to vector<1x128xf32>
    %44 = vector.broadcast %43 : vector<1x128xf32> to vector<8x128xf32>
    %45 = arith.mulf %41, %44 : vector<8x128xf32>
    %cst_36 = arith.constant dense<0.000000e+00> : vector<8xf32>
    %46 = vector.multi_reduction <add>, %45, %cst_36 [1] : vector<8x128xf32> to vector<8xf32>
    %47 = vector.shape_cast %46 : vector<8xf32> to vector<8x1xf32>
    %c1_37 = arith.constant 1 : index
    %48 = memref.load %arg6[%c1_37] : memref<2xf32, #tpu.memory_space<smem>>
    %49 = vector.broadcast %48 : f32 to vector<8x1xf32>
    %50 = arith.addf %47, %49 : vector<8x1xf32>
    %51 = vector.shape_cast %50 : vector<8x1xf32> to vector<8x1xf32>
    %52 = vector.broadcast %51 : vector<8x1xf32> to vector<8x128xf32>
    %c1_38 = arith.constant 1 : index
    %c0_39 = arith.constant 0 : index
    %c0_40 = arith.constant 0 : index
    %53 = vector.load %arg7[%c1_38, %c0_39, %c0_40] : memref<2x8x128xf32, #tpu.memory_space<vmem>>, vector<1x8x128xf32>
    %54 = vector.shape_cast %53 : vector<1x8x128xf32> to vector<8x128xf32>
    %55 = vector.shape_cast %52 : vector<8x128xf32> to vector<1x8x128xf32>
    tpu.vector_store %arg7[%c1_38, %c0_39, %c0_40], %55 {strides = array<i32>} : memref<2x8x128xf32, #tpu.memory_space<vmem>>, vector<1x8x128xf32>,
    return
  }
}

</mosaic_0001>

<bundles_post_ra>
// kernel: cluster_qnet_apply_both.1
= control target key start
LH: loop header
LB: loop body
LE: loop exit
PB: predicated region body
PF: predicated region fallthrough
CT: control target
= control target key end

     0   :  { %12 = vsyncpa [#allocation3], 0  ;;  %s791_s0 = inlined_call_operand.hbm [shape: f32[1,32], index: 0, kind: input, shape index: {}]   ;;  %s792_s1 = inlined_call_operand.hbm [shape: f32[8,32], index: 1, kind: input, shape index: {}]   ;;  %s793_s2 = inlined_call_operand.hbm [shape: f32[2,32,128], index: 2, kind: input, shape index: {}]   ;;  %s794_s3 = inlined_call_operand.hbm [shape: f32[2,32,128], index: 3, kind: input, shape index: {}]   ;;  %s795_s4 = inlined_call_operand.vmem [shape: f32[2,1,128], index: 4, kind: input, shape index: {}]   ;;  %s796_s5 = inlined_call_operand.vmem [shape: f32[2,1,128], index: 5, kind: input, shape index: {}]   ;;  %s797_s6 = inlined_call_operand.vmem [shape: f32[2], index: 6, kind: input, shape index: {}]   ;;  %s798_s7 = inlined_call_operand.vmem [shape: f32[2,8,128], index: 7, kind: output, shape index: {}]  }
   0x1   :  { %13 = vsyncpa [#allocation6], 0 }
   0x2   :  { %14 = vsyncpa [#allocation9], 0 }
   0x3   :  { %15 = vsyncpa [#allocation4], 0  ;;  %s664_s24 = smov [#allocation5]   ;;  %s665_s26 = smov [#allocation2]  }
   0x4   :  { %s32_s25 = sshll.u32 %s664_s24, 4  ;;  %s22_s27 = sshll.u32 %s665_s26, 4  ;;  %s33_s25 = int_to_ptr.vmem [resolvable:$true] %s32_s25  ;;  %s23_s27 = int_to_ptr.vmem [resolvable:$true] %s22_s27 }
   0x5   :  { %s556_s30 = scalar_lea.hbm %s792_s1, 128 }
   0x6   :  { %p557_p0 = scmp.ne.s32.totalorder %s792_s1, %s556_s30  ;;  %p560_p1 = scmp.lt.u32.totalorder %s556_s30, %s792_s1 }
   0x8   :  { %p562_p2 = pnand %p560_p1, %p557_p0 }
   0xa   :  { %565 = shalt.err (!%p562_p2)
}
   0xb   :  { %s566_s12 = scalar_lea.vmem %s33_s25, 128  ;;  %p571_p4 = scmp.lt.s32.totalorder %s33_s25, %s33_s25 }
   0xc   :  { %p567_p3 = scmp.ne.s32.totalorder %s33_s25, %s566_s12  ;;  %p572_p5 = scmp.lt.s32.totalorder %s566_s12, %s566_s12 }
   0xe   :  { %p573_p6 = por %p572_p5, %p571_p4 }
  0x10   :  { %p574_p7 = pnand %p573_p6, %p567_p3 }
  0x12   :  { %577 = shalt.err (!%p574_p7)
}
  0x13   :  { %35 = dma.hbm_to_vmem [thread:$0]  %s792_s1, 128, %s33_s25, [#allocation6]  }
  0x14   :  { %s578_s17 = scalar_lea.hbm %s791_s0, 16 }
  0x15   :  { %p579_p8 = scmp.ne.s32.totalorder %s791_s0, %s578_s17  ;;  %p582_p9 = scmp.lt.u32.totalorder %s578_s17, %s791_s0 }
  0x17   :  { %p584_p10 = pnand %p582_p9, %p579_p8 }
  0x19   :  { %587 = shalt.err (!%p584_p10)
}
  0x1a   :  { %s588_s22 = scalar_lea.vmem %s23_s27, 16  ;;  %s592_s23 = scalar_lea.vmem %s23_s27, 32 }
  0x1b   :  { %p589_p11 = scmp.ne.s32.totalorder %s23_s27, %s588_s22  ;;  %p593_p12 = scmp.lt.s32.totalorder %s23_s27, %s23_s27 }
  0x1c   :  { %p594_p13 = scmp.lt.s32.totalorder %s592_s23, %s588_s22 }
  0x1e   :  { %p595_p0 = por %p594_p13, %p593_p12 }
  0x20   :  { %p596_p1 = pnand %p595_p0, %p589_p11 }
  0x22   :  { %599 = shalt.err (!%p596_p1)
}
  0x23   :  { %25 = dma.hbm_to_vmem [thread:$0]  %s791_s0, 16, %s23_s27, [#allocation3]  }
  0x24   :  { %s666_s25 = smov [#allocation7]   ;;  %s600_s30 = scalar_lea.hbm %s793_s2, 1024 }
  0x25   :  { %s41_s26 = sshll.u32 %s666_s25, 4  ;;  %p601_p2 = scmp.ne.s32.totalorder %s793_s2, %s600_s30  ;;  %s42_s26 = int_to_ptr.vmem [resolvable:$true] %s41_s26 }
  0x26   :  { %p604_p3 = scmp.lt.u32.totalorder %s600_s30, %s793_s2 }
  0x28   :  { %p606_p4 = pnand %p604_p3, %p601_p2 }
  0x2a   :  { %609 = shalt.err (!%p606_p4)
}
  0x2b   :  { %s610_s12 = scalar_lea.vmem %s42_s26, 1024  ;;  %p615_p6 = scmp.lt.s32.totalorder %s42_s26, %s42_s26 }
  0x2c   :  { %p611_p5 = scmp.ne.s32.totalorder %s42_s26, %s610_s12  ;;  %p616_p7 = scmp.lt.s32.totalorder %s610_s12, %s610_s12 }
  0x2e   :  { %p617_p8 = por %p616_p7, %p615_p6 }
  0x30   :  { %p618_p9 = pnand %p617_p8, %p611_p5 }
  0x32   :  { %621 = shalt.err (!%p618_p9)
}
  0x33   :  { %s667_s0 = smov 128   ;;  %s668_s27 = smov 8  }
  0x34   :  { %47 = dma.hbm_to_vmem [thread:$0]  %s793_s2, 1024, %s42_s26, [#allocation6], %s667_s0, %s667_s0, %s668_s27  }
  0x35   :  { %s669_s15 = smov [#allocation8]   ;;  %s70_s19 = sshll.u32 %s797_s6, 4  ;;  %s71_s19 = int_to_ptr.vmem [resolvable:$true] %s70_s19 }
  0x36   :  { %s53_s16 = sshll.u32 %s669_s15, 4  ;;  %s622_s22 = scalar_lea.hbm %s794_s3, 1024  ;;  %s54_s16 = int_to_ptr.vmem [resolvable:$true] %s53_s16 }
  0x37   :  { %p623_p10 = scmp.ne.s32.totalorder %s794_s3, %s622_s22  ;;  %p626_p11 = scmp.lt.u32.totalorder %s622_s22, %s794_s3 }
  0x39   :  { %p628_p12 = pnand %p626_p11, %p623_p10 }
  0x3b   :  { %631 = shalt.err (!%p628_p12)
}
  0x3c   :  { %s632_s2 = scalar_lea.vmem %s54_s16, 1024  ;;  %p637_p0 = scmp.lt.s32.totalorder %s54_s16, %s54_s16 }
  0x3d   :  { %p633_p13 = scmp.ne.s32.totalorder %s54_s16, %s632_s2  ;;  %p638_p1 = scmp.lt.s32.totalorder %s632_s2, %s632_s2 }
  0x3f   :  { %p639_p2 = por %p638_p1, %p637_p0 }
  0x41   :  { %p640_p3 = pnand %p639_p2, %p633_p13 }
  0x43   :  { %643 = shalt.err (!%p640_p3)
}
  0x44   :  { %59 = dma.hbm_to_vmem [thread:$0]  %s794_s3, 1024, %s54_s16, [#allocation9], %s667_s0, %s667_s0, %s668_s27  }
  0x45   :  { %s644_s28 = scalar_lea.vmem %s71_s19, 16  ;;  %p649_p5 = scmp.lt.s32.totalorder %s71_s19, %s71_s19 }
  0x46   :  { %p645_p4 = scmp.ne.s32.totalorder %s71_s19, %s644_s28  ;;  %p650_p6 = scmp.lt.s32.totalorder %s644_s28, %s644_s28 }
  0x48   :  { %p651_p7 = por %p650_p6, %p649_p5 }
  0x4a   :  { %p652_p8 = pnand %p651_p7, %p645_p4 }
  0x4c   :  { %655 = shalt.err (!%p652_p8)
}
  0x4d   :  { %s670_s29 = smov [#allocation10]  }
  0x4e   :  { %73 = dma.vmem_to_smem %s71_s19, 16, %s670_s29, [#allocation4]  }
  0x4f   :  { %656 = dma.done.wait [#allocation3], 16  }
  0x50   :  { %657 = vsyncadd [#allocation3], 4294967280 }
  0x51   :  { %658 = dma.done.wait [#allocation6], 1152  }
  0x52   :  { %659 = vsyncadd [#allocation6], 4294966144 }
  0x53   :  { %660 = dma.done.wait [#allocation9], 1024  }
  0x54   :  { %661 = vsyncadd [#allocation9], 4294966272 }
  0x55   :  { %662 = dma.done.wait [#allocation4], 16  }
  0x56   :  { %663 = vsyncadd [#allocation4], 4294967280 }
  0x57   :  { %89 = sfence }
  0x58   :  { %v92_v0 = vld [vmem:[#allocation7] sm:$0xff]  ;;  %v93_v1 = vld [vmem:[#allocation7 + $0x8] sm:$0xff]  ;;  %v671_v3 = vmov 0.0|0.0   ;;  %v94_v6 = vld [vmem:[#allocation7 + $0x10] sm:$0xff]  ;;  %vm672_vm0 = vmmov 0   ;;  %v673_v9 = vmov 0.0   ;;  %v175_v28 = vlaneseq }
  0x59   :  { %v171_v2 = vld [vmem:[#allocation8] sm:$0xff]  ;;  %522 = vmatprep.subr.bf16.mxu0 %v671_v3  ;;  %v523_v4 = vpack.c.bf16 %v93_v1, %v92_v0  ;;  %528 = vmatprep.subr.bf16.mxu1 %v671_v3  ;;  %v172_v5 = vld [vmem:[#allocation8 + $0x8] sm:$0xff]  ;;  %v95_v7 = vld [vmem:[#allocation7 + $0x18] sm:$0xff]  ;;  %vm97_vm1 = vcmask 261120   ;;  %s456_s27 = sld [smem:[#allocation10 + $0x1]] }
  0x5a   :  { %v529_v8 = vpack.c.bf16 %v172_v5, %v171_v2  ;;  %486 = vmatprep.mubr.msk.f32.mxu0 %vm672_vm0, %v673_v9  ;;  %v173_v10 = vld [vmem:[#allocation8 + $0x10] sm:$0xff]  ;;  %v174_v11 = vld [vmem:[#allocation8 + $0x18] sm:$0xff]  ;;  %497 = vmatprep.mubr.msk.f32.mxu1 %vm672_vm0, %v673_v9  ;;  %v526_v12 = vpack.c.bf16 %v95_v7, %v94_v6  ;;  %v268_v14 = vld [vmem:[#allocation7 + $0x20] sm:$0xff]  ;;  %v176_v29 = vshrl.u32 %v175_v28, 7 }
  0x5b   :  { %524 = vmatpush3.bf16.msra.mxu0 %v523_v4  ;;  %v532_v13 = vpack.c.bf16 %v174_v11, %v173_v10  ;;  %v269_v15 = vld [vmem:[#allocation7 + $0x28] sm:$0xff]  ;;  %v345_v16 = vld [vmem:[#allocation8 + $0x20] sm:$0xff]  ;;  %v90_v18 = vld [vmem:[#allocation2] sm:$0x1] }
  0x5c   :  { %525 = vmatprep.subr.bf16.mxu0 %v671_v3  ;;  %530 = vmatpush3.bf16.msra.mxu1 %v529_v8  ;;  %v346_v17 = vld [vmem:[#allocation8 + $0x28] sm:$0xff]  ;;  %v535_v19 = vpack.c.bf16 %v269_v15, %v268_v14  ;;  %v91_v20 = vld [vmem:[#allocation5] sm:$0xff]  ;;  %v270_v22 = vld [vmem:[#allocation7 + $0x30] sm:$0xff]  ;;  %v177_v31 = vsub.s32 0, %v176_v29 }
  0x5d   :  { %531 = vmatprep.subr.bf16.mxu1 %v671_v3  ;;  %v541_v21 = vpack.c.bf16 %v346_v17, %v345_v16  ;;  %v271_v23 = vld [vmem:[#allocation7 + $0x38] sm:$0xff]  ;;  %v347_v24 = vld [vmem:[#allocation8 + $0x30] sm:$0xff]  ;;  %v96_v30 = vld [vmem:[%s795_s4] sm:$0x1] }
  0x5e   :  { %v348_v25 = vld [vmem:[#allocation8 + $0x38] sm:$0xff]  ;;  %v538_v26 = vpack.c.bf16 %v271_v23, %v270_v22  ;;  %v451_v39 = vld [vmem:[%s795_s4 + $0x1] sm:$0x1]  ;;  %v450_v40 = vld [vmem:[%s796_s5] ss:$0 sm:$0xff]  ;;  %s263_s4 = sld [smem:[#allocation10]] }
  0x5f   :  { %527 = vmatpush3.bf16.msra.mxu0 %v526_v12  ;;  %v544_v27 = vpack.c.bf16 %v348_v25, %v347_v24  ;;  %v455_v50 = vld [vmem:[%s796_s5 + $0x1] ss:$0 sm:$0xff]  ;;  %v436_v56 = vstv %s456_s27 }
  0x60   :  { %533 = vmatpush3.bf16.msra.mxu1 %v532_v13  ;;  %534 = vmatprep.subr.bf16.mxu0 %v671_v3 }
  0x61   :  { %540 = vmatprep.subr.bf16.mxu1 %v671_v3 }
  0x62   :  { %487 = vmatmul.mubr.msk.f32.vlgmr.msra.gmra.mrb[0].mxu0 %vm97_vm1, %v90_v18 }
  0x63   :  { %536 = vmatpush3.bf16.msra.mxu0 %v535_v19  ;;  %498 = vmatmul.mubr.msk.f32.vlgmr.msra.gmra.mrb[0].mxu1 %vm97_vm1, %v91_v20 }
  0x64   :  { %537 = vmatprep.subr.bf16.mxu0 %v671_v3  ;;  %542 = vmatpush3.bf16.msra.mxu1 %v541_v21  ;;  %v264_v53 = vstv %s263_s4 }
  0x65   :  { %508 = vmatprep.mubr.msk.f32.mxu0 %vm672_vm0, %v673_v9  ;;  %543 = vmatprep.subr.bf16.mxu1 %v671_v3 }
  0x66   :  { %519 = vmatprep.mubr.msk.f32.mxu1 %vm672_vm0, %v673_v9 }
  0x67   :  { %539 = vmatpush3.bf16.msra.mxu0 %v538_v26 }
  0x68   :  { %545 = vmatpush3.bf16.msra.mxu1 %v544_v27 }
  0x6a   :  { %509 = vmatmul.mubr.msk.f32.vlgmr.msra.gmra.mrb[2].mxu0 %vm97_vm1, %v90_v18 }
  0x6b   :  { %520 = vmatmul.mubr.msk.f32.vlgmr.msra.gmra.mrb[2].mxu1 %vm97_vm1, %v91_v20 }
 0x135   :  { %v167_v32 = vpop.f32.mrb[0].mxu0 }
 0x136   :  { %v168_v33 = vadd.f32 %v167_v32, %v96_v30  ;;  %v488_v34 = vpop.f32.mrb[1].mxu0  ;;  %v248_v35 = vpop.f32.mrb[0].mxu1 }
 0x137   :  { %v499_v36 = vpop.f32.mrb[1].mxu1 }
 0x138   :  { %v178_v37 = vrot.slane %v168_v33, %v177_v31 }
 0x13a   :  { %v249_v38 = vadd.f32 %v248_v35, %v178_v37 }
 0x13c   :  { %v252_v41 = vmax.f32 %v249_v38, 0.0 }
 0x13d   :  { %v340_v42 = vpop.f32.mrb[2].mxu0 }
 0x13e   :  { %v341_v43 = vadd.f32 %v451_v39, %v340_v42  ;;  %v510_v44 = vpop.f32.mrb[3].mxu0  ;;  %v419_v45 = vpop.f32.mrb[2].mxu1  ;;  %v260_v46 = vmul.f32 %v450_v40, %v252_v41 }
 0x13f   :  { %v521_v47 = vpop.f32.mrb[3].mxu1 }
 0x140   :  { %v352_v48 = vrot.slane %v341_v43, %v177_v31  ;;  %261 = vadd.xlane.f32.xlu0 %v260_v46 }
 0x142   :  { %v420_v49 = vadd.f32 %v419_v45, %v352_v48 }
 0x144   :  { %v423_v51 = vmax.f32 %v420_v49, 0.0 }
 0x146   :  { %v432_v52 = vmul.f32 %v455_v50, %v423_v51 }
 0x148   :  { %433 = vadd.xlane.f32.xlu0 %v432_v52 }
 0x1cd   :  { %v262_v54 = vpop.xlane.xlu0 %261 }
 0x1ce   :  { %v265_v55 = vadd.f32 %v264_v53, %v262_v54 }
 0x1d0   :  { %266 = vst [vmem:[%s798_s7] sm:$0xff] %v265_v55 }
 0x1d5   :  { %v434_v57 = vpop.xlane.xlu0 %433 }
 0x1d6   :  { %v437_v58 = vadd.f32 %v436_v56, %v434_v57 }
 0x1d8   :  { %457 = vst [vmem:[%s798_s7 + $0x8] sm:$0xff] %v437_v58 }
 0x1d9   :  { %444 = vsyncpa [#allocation3], 1 }
 0x1da   :  { %445 = vsyncpa [#allocation6], 1 }
 0x1db   :  { %446 = vsyncpa [#allocation9], 1 }
 0x1dc   :  { %447 = vsyncpa [#allocation4], 1 }

</bundles_post_ra>
